<compile_context>
chip_gen: v7x
topology: tpu7x:2x2x1
jax: 0.10.0
libtpu: 0.0.40
codegen_flags: <defaults>
</compile_context>

<pallas_src>
import jax
import jax.numpy as jnp
from jax.experimental import pallas as pl
from jax.experimental.pallas import tpu as pltpu


_LANES = 512                     # lane-dense chunk width (multiple of 128)
_SUBLANES = 8                    # sublane granularity
_TARGET_BLOCK_BYTES = 1 << 20    # ~1 MiB per block per operand


def _round_up(x, m):
    return ((x + m - 1) // m) * m


def _cdiv(a, b):
    return -(-a // b)


def _drop_path_kernel(scale_ref, x_ref, o_ref):
    # scale_ref: VMEM (1, 1, 1) f32  -- per-sample mask / keep_prob
    # x_ref/o_ref: VMEM (1, r_tile, _LANES) lane-dense tile of the flat sample
    scale = scale_ref[0, 0, 0]
    o_ref[...] = (x_ref[...].astype(jnp.float32) * scale).astype(o_ref.dtype)


def drop_path_pallas(x, drop_prob: float = 0.0, training: bool = False, *, key=None):
    """Pallas DropPath forward. x: [B, ...] (any trailing shape)."""
    if drop_prob == 0.0 or not training:
        return x
    assert key is not None, "need a PRNG key in training mode"
    assert jnp.issubdtype(x.dtype, jnp.floating), "DropPath expects floating-point x"

    keep_prob = 1.0 - drop_prob
    orig_shape = x.shape
    B = orig_shape[0]
    n = 1
    for d in orig_shape[1:]:
        n *= int(d)

    # Per-sample bernoulli(keep_prob) mask, same construction as the PyTorch
    # code: floor(keep_prob + uniform[0,1)).  Fold 1/keep_prob in so the kernel
    # is a single f32 multiply.  (JAX PRNG stream will not bit-match PyTorch's.)
    u = jax.random.uniform(key, (B,), dtype=jnp.float32)
    mask = jnp.floor(keep_prob + u)                           # {0., 1.}
    scale = (mask / jnp.float32(keep_prob)).reshape(B, 1, 1)  # f32 (B,1,1)

    # ---- choose lane-dense tiling of the flattened per-sample payload -------
    itemsize = jnp.dtype(x.dtype).itemsize
    rows_total = max(1, _cdiv(n, _LANES))
    max_rows = max(
        _SUBLANES,
        (_TARGET_BLOCK_BYTES // (_LANES * itemsize)) // _SUBLANES * _SUBLANES,
    )
    rows_rounded = _round_up(rows_total, _SUBLANES)
    num_chunks = _cdiv(rows_rounded, max_rows)
    r_tile = _round_up(_cdiv(rows_rounded, num_chunks), _SUBLANES)
    rows_pad = r_tile * num_chunks
    n_pad = rows_pad * _LANES

    x_flat = x.reshape(B, n)
    if n_pad != n:
        x_flat = jnp.pad(x_flat, ((0, 0), (0, n_pad - n)))
    x_view = x_flat.reshape(B, rows_pad, _LANES)

    grid = (B, num_chunks)

    out_view = pl.pallas_call(
        _drop_path_kernel,
        out_shape=jax.ShapeDtypeStruct((B, rows_pad, _LANES), x.dtype),
        grid=grid,
        in_specs=[
            # tiny broadcast scale block; block index constant along the row
            # axis so it is not re-fetched per chunk
            pl.BlockSpec((1, 1, 1), lambda b, r: (b, 0, 0)),
            pl.BlockSpec((1, r_tile, _LANES), lambda b, r: (b, r, 0)),
        ],
        out_specs=pl.BlockSpec((1, r_tile, _LANES), lambda b, r: (b, r, 0)),
        compiler_params=pltpu.CompilerParams(
            dimension_semantics=("parallel", "parallel"),
        ),
        # TODO(synk): add input_output_aliases={1: 0} when callers donate x and
        # no tail padding is needed (in-place scale, saves one HBM buffer).
    )(scale, x_view)

    out_flat = out_view.reshape(B, n_pad)
    if n_pad != n:
        out_flat = out_flat[:, :n]
    return out_flat.reshape(orig_shape)


def drop_path_ref(x, drop_prob, training, key):
    # Pure-JAX reference mirroring the PyTorch implementation.
    if drop_prob == 0.0 or not training:
        return x
    keep_prob = 1.0 - drop_prob
    u = jax.random.uniform(key, (x.shape[0],), dtype=jnp.float32)
    mask = jnp.floor(keep_prob + u).reshape((x.shape[0],) + (1,) * (x.ndim - 1))
    return x / keep_prob * mask.astype(x.dtype)


if __name__ == "__main__":
    key = jax.random.PRNGKey(0)
    k_x, k_x2, k_mask = jax.random.split(key, 3)

    drop_prob = 0.25

    # Case 1: the reference shape from the module (NCHW, HW multiple of lanes).
    B, C, H, W = 2, 4, 16, 16
    x = jax.random.normal(k_x, (B, C, H, W), dtype=jnp.float32)
    y = drop_path_pallas(x, drop_prob=drop_prob, training=True, key=k_mask)
    y = jax.block_until_ready(y)
    y_ref = drop_path_ref(x, drop_prob, True, k_mask)
    assert jnp.allclose(y, y_ref, atol=1e-5, rtol=1e-5)

    # Case 2: non-128-multiple spatial size (exercises tail padding path).
    x2 = jax.random.normal(k_x2, (2, 3, 14, 14), dtype=jnp.float32)
    y2 = drop_path_pallas(x2, drop_prob=drop_prob, training=True, key=k_mask)
    y2 = jax.block_until_ready(y2)
    y2_ref = drop_path_ref(x2, drop_prob, True, k_mask)
    assert jnp.allclose(y2, y2_ref, atol=1e-5, rtol=1e-5)

    # Eval mode / drop_prob == 0: identity.
    y_eval = drop_path_pallas(x, drop_prob=drop_prob, training=False, key=k_mask)
    y_eval = jax.block_until_ready(y_eval)
    assert jnp.allclose(y_eval, x)
    y_p0 = drop_path_pallas(x, drop_prob=0.0, training=True, key=k_mask)
    assert jnp.allclose(jax.block_until_ready(y_p0), x)

    print("KERNEL_OK")
</pallas_src>

<mosaic_0001>
module attributes {stable_mosaic.version = 11 : i64} {
  func.func @_drop_path_kernel(%arg0: i32, %arg1: i32, %arg2: memref<1x1x1xf32, #tpu.memory_space<vmem>>, %arg3: memref<1x8x512xf32, #tpu.memory_space<vmem>>, %arg4: memref<1x8x512xf32, #tpu.memory_space<vmem>>) attributes {dimension_semantics = [#tpu.dimension_semantics<parallel>, #tpu.dimension_semantics<parallel>], iteration_bounds = array<i64: 2, 1>, scalar_prefetch = 0 : i64, scratch_operands = 0 : i64, tpu.core_type = #tpu.core_type<tc>, window_params = [{transform_indices = @transform_0, window_bounds = array<i64: 1, 1, 1>}, {transform_indices = @transform_1, window_bounds = array<i64: 1, 8, 512>}, {transform_indices = @transform_2, window_bounds = array<i64: 1, 8, 512>}]} {
    %c0 = arith.constant 0 : index
    %c0_0 = arith.constant 0 : index
    %c0_1 = arith.constant 0 : index
    %0 = vector.load %arg2[%c0, %c0_0, %c0_1] : memref<1x1x1xf32, #tpu.memory_space<vmem>>, vector<1x1x1xf32>
    %1 = vector.extract %0[0, 0, 0] : f32 from vector<1x1x1xf32>
    %c0_2 = arith.constant 0 : index
    %c0_3 = arith.constant 0 : index
    %c0_4 = arith.constant 0 : index
    %2 = vector.load %arg3[%c0_2, %c0_3, %c0_4] : memref<1x8x512xf32, #tpu.memory_space<vmem>>, vector<1x8x512xf32>
    %3 = vector.broadcast %1 : f32 to vector<1x8x512xf32>
    %4 = arith.mulf %2, %3 : vector<1x8x512xf32>
    %c0_5 = arith.constant 0 : index
    %c0_6 = arith.constant 0 : index
    %c0_7 = arith.constant 0 : index
    %5 = vector.load %arg4[%c0_5, %c0_6, %c0_7] : memref<1x8x512xf32, #tpu.memory_space<vmem>>, vector<1x8x512xf32>
    tpu.vector_store %arg4[%c0_5, %c0_6, %c0_7], %4 {strides = array<i32>} : memref<1x8x512xf32, #tpu.memory_space<vmem>>, vector<1x8x512xf32>,
    return
  }
  func.func @transform_0(%arg0: i32, %arg1: i32) -> (i32, i32, i32) {
    %c0_i32 = arith.constant 0 : i32
    %c0_i32_0 = arith.constant 0 : i32
    %c0_i32_1 = arith.constant 0 : i32
    return %arg0, %c0_i32, %c0_i32_0 : i32, i32, i32
  }
  func.func @transform_1(%arg0: i32, %arg1: i32) -> (i32, i32, i32) {
    %c0_i32 = arith.constant 0 : i32
    %c0_i32_0 = arith.constant 0 : i32
    return %arg0, %arg1, %c0_i32 : i32, i32, i32
  }
  func.func @transform_2(%arg0: i32, %arg1: i32) -> (i32, i32, i32) {
    %c0_i32 = arith.constant 0 : i32
    %c0_i32_0 = arith.constant 0 : i32
    return %arg0, %arg1, %c0_i32 : i32, i32, i32
  }
}

</mosaic_0001>

<bundles_post_ra>
// kernel: tpu_custom_call.1
= control target key start
LH: loop header
LB: loop body
LE: loop exit
PB: predicated region body
PF: predicated region fallthrough
CT: control target
= control target key end

     0   :  { %7 = vsyncpa [#allocation3], 0  ;;  %s706_s0 = inlined_call_operand.vmem [shape: f32[2,1,1], index: 0, kind: input, shape index: {}]   ;;  %s707_s1 = inlined_call_operand.hbm [shape: f32[2,8,512], index: 1, kind: input, shape index: {}]   ;;  %s708_s2 = inlined_call_operand.hbm [shape: f32[2,8,512], index: 2, kind: output, shape index: {}]  }
   0x1   :  { %9 = vsyncpa [#allocation3 + $0x1], 0 }
   0x2   :  { %10 = vsyncpa [#allocation4], 0 }
   0x3   :  { %12 = vsyncpa [#allocation4 + $0x1], 0  ;;  %s529_s9 = smov 0   ;;  %s531_s10 = smov 0  }
   0x4   :  { %s533_s11 = smov 0   ;;  %s535_s12 = smov 0  }
   0x5   :  { %s537_s13 = smov 0   ;;  %s539_s14 = smov 0  }
   0x6 LB: > { %s317_s15 = sadd.s32 4294967295, %s510_s14   ;;  %s318_s16 = sadd.s32 4294967294, %s510_s14   ;;  %s510_s14 = sphi %s539_s14, %s18_s14   ;;  %s506_s13 = sphi %s537_s13, %s724_s13   ;;  %s502_s12 = sphi %s535_s12, %s723_s12   ;;  %s498_s11 = sphi %s533_s11, %s722_s11   ;;  %s494_s10 = sphi %s531_s10, %s721_s10   ;;  %s490_s9 = sphi %s529_s9, %s720_s9  }
   0x7   : > { %s30_s17 = sadd.s32 1, %s506_s13  ;;  %s65_s18 = sadd.s32 1, %s498_s11 }
   0x8   : > { %p32_p0 = scmp.ge.s32.totalorder %s30_s17, 2  ;;  %p72_p1 = scmp.ne.s32.totalorder %s498_s11, %s494_s10 }
   0x9   : > { %p73_p2 = scmp.eq.s32.totalorder %s510_s14, 0  ;;  %p78_p3 = scmp.ne.s32.totalorder %s494_s10, %s490_s9 }
   0xa   : > { %s726_s17 = smov (%p32_p0, %s30_s17), 0  ;;  %p79_p5 = scmp.eq.s32.totalorder %s317_s15, 0 }
   0xb   : > { %p570_p4 = por %p73_p2, %p72_p1  ;;  %s60_s20 = ssub.s32 %s506_s13, %s726_s17 }
   0xc   : > { %p104_p6 = scmp.eq.s32.totalorder %s317_s15, 1  ;;  %p63_p7 = scmp.eq.s32.totalorder %s60_s20, 0 }
   0xd   : > { %p576_p8 = por %p79_p5, %p78_p3  ;;  %p110_p10 = scmp.eq.s32.totalorder %s318_s16, 1 }
   0xe   : > { %p580_p9 = por %p104_p6, %p72_p1  ;;  %p348_p13 = scmp.lt.s32.totalorder %s510_s14, 2 }
   0xf   : > { %s585_s23 = scalar_select %p63_p7, %s498_s11, %s65_s18  }
  0x10   : > { %s712_s22 = scalar_select %p580_p9, 1, 0 }
  0x11   : > { %p587_p11 = por %p110_p10, %p78_p3  ;;  %s136_s25 = sand.u32 1, %s498_s11  }
  0x12   : > { %s321_s26 = sshll.u32 %s136_s25, 5  ;;  %s332_s27 = sshll.u32 %s506_s13, 9 }
  0x13   : > { %s713_s24 = scalar_select %p587_p11, 1, 0 }
  0x14   : > { %s598_s30 = scalar_lea.hbm %s707_s1, %s332_s27  ;;  %s140_s3 = scalar_lea.vmem [#allocation2], %s321_s26 }
  0x15   : > { %s150_s4 = sshll.u32 %s140_s3, 4  ;;  %p604_p0 = pnand %p348_p13, %p570_p4  ;;  %s600_s4 = int_to_ptr.vmem [resolvable:$true] %s150_s4 }
  0x16   : > { %s137_s6 = scalar_lea.sflag [#allocation3], %s136_s25  ;;  %s398_s7 = scalar_lea.hbm %s598_s30, 512 }
  0x17   : > { %p399_p3 = scmp.ne.s32.totalorder %s598_s30, %s398_s7  ;;  %p400_p5 = pneg %p604_p0 }
  0x18   : > { %s403_s16 = scalar_lea.hbm %s707_s1, 1024  ;;  %p404_p4 = scmp.lt.u32.totalorder %s598_s30, %s707_s1 }
  0x19   : > { %p401_p6 = pnand %p400_p5, %p399_p3  ;;  %p405_p10 = scmp.lt.u32.totalorder %s403_s16, %s398_s7 }
  0x1a   : > { %p407_p12 = scmp.lt.u32.totalorder %s398_s7, %s598_s30 }
  0x1b   : > { %p402_p7 = pneg %p401_p6  ;;  %p406_p13 = por %p405_p10, %p404_p4 }
  0x1d   : > { %p408_p1 = por %p407_p12, %p406_p13 }
  0x1f   : > { %p409_p2 = pnand %p408_p1, %p402_p7 }
  0x21   : > { %412 = shalt.err (!%p409_p2)
}
  0x22   : > { %s413_s20 = scalar_lea.vmem %s600_s4, 512  ;;  %s512_s25 = smov [#allocation2]  }
  0x23   : > { %p414_p3 = scmp.ne.s32.totalorder %s600_s4, %s413_s20  ;;  %s418_s26 = sshll.u32 %s512_s25, 4  ;;  %s419_s26 = int_to_ptr.vmem [resolvable:$false] %s418_s26 }
  0x24   : > { %s420_s27 = scalar_lea.vmem %s419_s26, 1024  ;;  %p421_p9 = scmp.lt.s32.totalorder %s600_s4, %s419_s26 }
  0x25   : > { %p416_p6 = pnand %p414_p3, %p400_p5  ;;  %p422_p4 = scmp.lt.s32.totalorder %s420_s27, %s413_s20 }
  0x27   : > { %p417_p11 = pneg %p416_p6  ;;  %p423_p10 = por %p422_p4, %p421_p9 }
  0x29   : > { %p424_p12 = pnand %p423_p10, %p417_p11 }
  0x2b   : > { %427 = shalt.err (!%p424_p12)
}
  0x2c   : > { %343 = dma.hbm_to_vmem [thread:$0]  (!%p604_p0), %s598_s30, 512, %s600_s4, %s137_s6  }
  0x2d   : > { %p715_p1 = scmp.lt.s32.totalorder %s510_s14, 3  ;;  %p716_p2 = scmp.ge.s32.totalorder %s510_s14, 1 }
  0x2f   : > { %p156_p5 = pnand %p716_p2, %p715_p1 }
  0x30   : > { %s640_s28 = sand.u32 (!%p156_p5), 1, %s494_s10  }
  0x31   : > { %159 = sbr.rel (%p156_p5) target bundleno = 131 (0x83), region = 28  ;;  %s325_s29 = sshll.u32 (!%p156_p5), %s640_s28, 5 }
  0x32   : > { %s162_s3 = scalar_lea.sflag (!%p156_p5), [#allocation3], %s640_s28  ;;  %s165_s7 = scalar_lea.vmem (!%p156_p5), [#allocation2], %s325_s29 }
  0x38   : > { %481 = dma.done.wait (%p576_p8), %s162_s3, 512  }
  0x39   : > { %483 = vsyncadd (%p576_p8), %s162_s3, 4294966784  ;;  %p189_p9 = scmp.lt.s32.totalorder %s502_s12, 1  ;;  %v194_v1 = vld [vmem:[%s165_s7] sm:$0xff]  ;;  %v195_v2 = vld [vmem:[%s165_s7 + $0x8] sm:$0xff]  ;;  %s333_s8 = sshll.u32 %s502_s12, 9 }
  0x3a   : > { %v196_v3 = vld [vmem:[%s165_s7 + $0x10] sm:$0xff]  ;;  %v197_v4 = vld [vmem:[%s165_s7 + $0x18] sm:$0xff]  ;;  %s188_s15 = scalar_lea.vmem [#allocation5], %s325_s29  ;;  %s657_s20 = scalar_lea.hbm %s708_s2, %s333_s8 }
  0x3b   : > { %s190_s30 = scalar_select %p189_p9, %s502_s12, 1 }
  0x3c   : > { %s224_s21 = sshll.u32 %s188_s15, 4  ;;  %s208_s12 = scalar_lea.sflag [#allocation4], %s640_s28  ;;  %s659_s21 = int_to_ptr.vmem [resolvable:$true] %s224_s21 }
  0x3d   : > { %s191_s6 = scalar_lea.vmem %s706_s0, %s190_s30  ;;  %s428_s25 = scalar_lea.vmem %s659_s21, 512 }
  0x3e   : > { %v192_v0 = vld [vmem:[%s191_s6] sm:$0x1]  ;;  %p429_p8 = scmp.ne.s32.totalorder %s659_s21, %s428_s25  ;;  %p717_p11 = scmp.ne.s32.totalorder %s712_s22, 0 }
  0x3f   : > { %334 = vpush %v192_v0  ;;  %s513_s26 = smov [#allocation5]  }
  0x40   : > { %p430_p0 = pnand %p429_p8, %p717_p11  ;;  %s432_s27 = sshll.u32 %s513_s26, 4  ;;  %s433_s27 = int_to_ptr.vmem [resolvable:$false] %s432_s27 }
  0x41   : > { %s434_s29 = scalar_lea.vmem %s433_s27, 1024  ;;  %p435_p13 = scmp.lt.s32.totalorder %s659_s21, %s433_s27 }
  0x42   : > { %p431_p7 = pneg %p430_p0  ;;  %p436_p3 = scmp.lt.s32.totalorder %s434_s29, %s428_s25 }
  0x44   : > { %p437_p6 = por %p436_p3, %p435_p13 }
  0x46   : > { %p438_p4 = pnand %p437_p6, %p431_p7 }
  0x70   : > { %s335_s16 = spop %334 }
  0x71   : > { %v198_v5 = vstv %s335_s16 }
  0x72   : > { %v199_v6 = vmul.f32 %v198_v5, %v194_v1  ;;  %v200_v7 = vmul.f32 %v198_v5, %v195_v2  ;;  %v201_v8 = vmul.f32 %v198_v5, %v196_v3  ;;  %v202_v9 = vmul.f32 %v198_v5, %v197_v4 }
  0x74   : > { %203 = vst [vmem:[%s188_s15] sm:$0xff] %v199_v6  ;;  %204 = vst [vmem:[%s188_s15 + $0x8] sm:$0xff] %v200_v7 }
  0x75   : > { %205 = vst [vmem:[%s188_s15 + $0x10] sm:$0xff] %v201_v8  ;;  %206 = vst [vmem:[%s188_s15 + $0x18] sm:$0xff] %v202_v9 }
  0x76   : > { %441 = shalt.err (!%p438_p4)
}
  0x77   : > { %s442_s28 = scalar_lea.hbm %s657_s20, 512  ;;  %s446_s30 = scalar_lea.hbm %s708_s2, 1024 }
  0x78   : > { %p443_p10 = scmp.ne.s32.totalorder %s657_s20, %s442_s28  ;;  %p447_p2 = scmp.lt.u32.totalorder %s657_s20, %s708_s2 }
  0x79   : > { %p448_p5 = scmp.lt.u32.totalorder %s446_s30, %s442_s28  ;;  %p450_p8 = scmp.lt.u32.totalorder %s442_s28, %s657_s20 }
  0x7a   : > { %p444_p12 = pnand %p443_p10, %p717_p11 }
  0x7b   : > { %p449_p9 = por %p448_p5, %p447_p2 }
  0x7c   : > { %p445_p1 = pneg %p444_p12 }
  0x7d   : > { %p451_p0 = por %p450_p8, %p449_p9 }
  0x7f   : > { %p452_p7 = pnand %p451_p0, %p445_p1 }
  0x81   : > { %455 = shalt.err (!%p452_p7)
}
  0x82   : > { %338 = dma.vmem_to_hbm [thread:$0]  (%p717_p11), %s659_s21, 512, %s657_s20, %s208_s12  }
  0x83 PF: > { %s236_s6 = sand.u32 1, %s490_s9   ;;  %p718_p13 = scmp.ne.s32.totalorder %s713_s24, 0 }
  0x84   : > { %p719_p3 = scmp.ge.s32.totalorder %s510_s14, 2  ;;  %s237_s8 = scalar_lea.sflag [#allocation4], %s236_s6 }
  0x86   : > { %p345_p6 = pnand %p719_p3, %p718_p13 }
  0x88   : > { %485 = dma.done.wait (!%p345_p6), %s237_s8, 512  }
  0x89   : > { %487 = vsyncadd (!%p345_p6), %s237_s8, 4294966784  ;;  %s18_s14 = sadd.s32 1, %s510_s14   ;;  %s720_s9 = smov %s494_s10 }
  0x8a   : > { %p15_p4 = scmp.ge.s32.totalorder %s18_s14, 4   ;;  %s721_s10 = smov %s498_s11 }
  0x8b   : > { %s722_s11 = smov %s585_s23  ;;  %s723_s12 = smov %s506_s13 }
  0x8c   : > { %s724_s13 = smov %s726_s17  ;;  %17 = sbr.rel (!%p15_p4) target bundleno = 6 (0x6), region = 76 }
  0x93   :  { %242 = vsyncpa [#allocation3], 1 }
  0x94   :  { %244 = vsyncpa [#allocation3 + $0x1], 1 }
  0x95   :  { %245 = vsyncpa [#allocation4], 1 }
  0x96   :  { %247 = vsyncpa [#allocation4 + $0x1], 1 }

</bundles_post_ra>
